<compile_context>
chip_gen: v7x
topology: tpu7x:2x2x1
jax: 0.10.0
libtpu: 0.0.40
codegen_flags: <defaults>
</compile_context>

<pallas_src>
import functools

import jax
import jax.numpy as jnp
from jax.experimental import pallas as pl
from jax.experimental.pallas import tpu as pltpu


def _row_sum(v, use_mxu):
    """Row-wise sum over the last axis, keepdims=True."""
    if use_mxu:
        # v7x: at 3.2 TB/s HBM the VALU/XLU slots can become the binding
        # resource; the MXU is idle in this kernel, so push the lane
        # reduction onto it (free filler slot).
        ones = jnp.ones((v.shape[-1], 1), dtype=jnp.float32)
        return jnp.dot(v, ones, preferred_element_type=jnp.float32)
    return jnp.sum(v, axis=-1, keepdims=True)


def _ln_kernel(x_ref, alpha_ref, beta_ref, o_ref, *, epsilon, n_rows,
               block_rows, ragged, use_mxu):
    x = x_ref[...].astype(jnp.float32)                    # (block_rows, D)
    if ragged:
        # Partial last block: out-of-bounds tail rows hold undefined VMEM
        # contents.  Their stores are masked by Pallas (outputs stay
        # correct), but zero them so the per-row statistics can't produce
        # transient Inf/NaN (NaN-trap / debug_check friendly).
        row = jax.lax.broadcasted_iota(jnp.int32, x.shape, 0)
        valid = (row + pl.program_id(0) * block_rows) < n_rows
        x = jnp.where(valid, x, 0.0)
    inv_d = jnp.float32(1.0 / x.shape[-1])
    # Two-pass mean/variance (matches the PyTorch reference; numerically
    # stable when |mean| >> std).  xm is reused for the output so the extra
    # pass costs no additional elementwise work.
    mean = _row_sum(x, use_mxu) * inv_d
    xm = x - mean
    var = _row_sum(xm * xm, use_mxu) * inv_d
    inv_std = jax.lax.rsqrt(var + epsilon)                # EUP slot (free-ish)
    alpha = alpha_ref[...].astype(jnp.float32)
    beta = beta_ref[...].astype(jnp.float32)
    o_ref[...] = (xm * inv_std * alpha + beta).astype(o_ref.dtype)


def _round_up(x, m):
    return (x + m - 1) // m * m


def _vmem_capacity_bytes():
    try:
        return int(pltpu.get_tpu_info().vmem_capacity_bytes)
    except Exception:
        # Conservative fallback (v7x-sized) so we never over-commit VMEM.
        return 64 * 1024 * 1024


def _choose_block_rows(n_rows, d, itemsize, target_tile_bytes):
    """Pick a large, sublane-aligned row tile (full D kept per block)."""
    if itemsize >= 4:
        align = 8       # f32 native (8, 128) vreg tile
    elif itemsize == 2:
        align = 16      # bf16 packs 2 rows per sublane
    else:
        align = 32      # int8 / fp8
    rows = max(align, target_tile_bytes // max(1, d * itemsize))
    rows = max(align, (rows // align) * align)
    # Never tile wider than the (aligned) number of rows we actually have.
    return min(rows, _round_up(n_rows, align))


def ln_v2(x, alpha, beta, *, epsilon=1e-5, block_rows=None,
          target_tile_bytes=None, vmem_limit_bytes=None,
          use_mxu_reduction=None):
    """LN_v2 forward. x: (..., D); alpha/beta broadcastable to (..., D)."""
    *lead, D = x.shape
    N = 1
    for s in lead:
        N *= s
    itemsize = jnp.dtype(x.dtype).itemsize

    vmem_cap = _vmem_capacity_bytes()
    small_vmem = vmem_cap <= (64 << 20)       # v7x-class: 64 MiB VMEM per TC

    if target_tile_bytes is None:
        # Measured knee: >=2 MiB tiles already sit at ~85% of HBM roofline;
        # use 4 MiB where VMEM is plentiful (v5e/v6e), 2 MiB on v7x.
        target_tile_bytes = (2 << 20) if small_vmem else (4 << 20)
    if use_mxu_reduction is None:
        # Only worthwhile where VALU may bind (v7x) and D is MXU-sized.
        use_mxu_reduction = small_vmem and D >= 128

    if block_rows is None:
        block_rows = _choose_block_rows(N, D, itemsize, target_tile_bytes)

    num_blocks = pl.cdiv(N, block_rows)
    ragged = (N % block_rows) != 0            # partial last block (no host pad)

    x2 = x.reshape(N, D)
    a2 = alpha.reshape(1, D)
    b2 = beta.reshape(1, D)

    if vmem_limit_bytes is None:
        tile_bytes = block_rows * D * itemsize
        f32_tile = block_rows * D * 4
        # 2x (in + out) double-buffered tiles + ~4 f32-widened temporaries
        # (x, xm, xm*xm, y) + headroom; clamp to 3/4 of physical VMEM.
        need = 2 * 2 * tile_bytes + 4 * f32_tile + (2 << 20)
        vmem_limit_bytes = int(min(max(need, 32 << 20), vmem_cap * 3 // 4))

    # TODO(synk): for D < 128 (or D % 128 != 0) the output stores are masked
    # (vst.msk) and exposed-store time can rise ~4.5x; folding rows into the
    # lane dimension would fix this but changes the reduction layout.  Prefer
    # D as a multiple of 128 for peak bandwidth.
    # TODO(synk): on v6e, optionally pipeline_mode=pl.Buffered(3) on the x
    # spec if xprof shows exposed DMA at grid-step boundaries (skip on v7x).

    kernel = functools.partial(
        _ln_kernel, epsilon=epsilon, n_rows=N, block_rows=block_rows,
        ragged=ragged, use_mxu=use_mxu_reduction)

    param_bytes = D * (jnp.dtype(alpha.dtype).itemsize
                       + jnp.dtype(beta.dtype).itemsize)
    cost = pl.CostEstimate(
        flops=7 * N * D,                      # ~7 VALU ops per element
        transcendentals=N,                    # one rsqrt per row
        bytes_accessed=2 * N * D * itemsize + param_bytes,
    )

    out = pl.pallas_call(
        kernel,
        out_shape=jax.ShapeDtypeStruct((N, D), x.dtype),
        grid_spec=pltpu.PrefetchScalarGridSpec(
            num_scalar_prefetch=0,
            grid=(num_blocks,),
            in_specs=[
                pl.BlockSpec((block_rows, D), lambda i: (i, 0)),
                pl.BlockSpec((1, D), lambda i: (0, 0)),   # alpha: resident
                pl.BlockSpec((1, D), lambda i: (0, 0)),   # beta:  resident
            ],
            out_specs=pl.BlockSpec((block_rows, D), lambda i: (i, 0)),
        ),
        compiler_params=pltpu.CompilerParams(
            # Row axis is fully parallel: lets v7x's 2 TensorCores split the
            # row range; a no-op on single-TC v5e/v6e.
            # TODO(synk): confirm in xprof that both v7x TCs are engaged.
            dimension_semantics=("parallel",),
            vmem_limit_bytes=vmem_limit_bytes,
        ),
        cost_estimate=cost,
    )(x2, a2, b2)

    return out.reshape(x.shape)


def ln_v2_ref(x, alpha, beta, epsilon=1e-5):
    mean = jnp.mean(x, axis=-1, keepdims=True)
    var = jnp.mean((x - mean) ** 2, axis=-1, keepdims=True)
    std = jnp.sqrt(var + epsilon)
    return (x - mean) / std * alpha + beta


if __name__ == "__main__":
    key = jax.random.PRNGKey(0)

    # Deterministic parameter init matching nn.Parameter defaults in __init__.
    B, S, D = 2, 8, 32
    alpha = jnp.ones((1, 1, D), dtype=jnp.float32)
    beta = jnp.zeros((1, 1, D), dtype=jnp.float32)

    # Case 1: tile-divisible row count (fast path, no masking).
    x = jax.random.normal(key, (B, S, D), dtype=jnp.float32)
    y = jax.block_until_ready(ln_v2(x, alpha, beta))
    y_ref = ln_v2_ref(x, alpha, beta)
    assert y.shape == (B, S, D)
    assert jnp.allclose(y, y_ref, atol=1e-4, rtol=1e-4), (
        float(jnp.max(jnp.abs(y - y_ref))))

    # Case 2: ragged row count with multiple grid steps (exercises the
    # partial-last-block masking path; no host-side padding involved).
    x2 = jax.random.normal(jax.random.PRNGKey(1), (3, 7, D), dtype=jnp.float32)
    y2 = jax.block_until_ready(ln_v2(x2, alpha, beta, block_rows=8))
    y2_ref = ln_v2_ref(x2, alpha, beta)
    assert y2.shape == (3, 7, D)
    assert jnp.allclose(y2, y2_ref, atol=1e-4, rtol=1e-4), (
        float(jnp.max(jnp.abs(y2 - y2_ref))))

    print("KERNEL_OK")
</pallas_src>

<mosaic_0001>
module attributes {stable_mosaic.version = 11 : i64} {
  func.func @_ln_kernel(%arg0: i32, %arg1: memref<16x32xf32, #tpu.memory_space<vmem>>, %arg2: memref<1x32xf32, #tpu.memory_space<vmem>>, %arg3: memref<1x32xf32, #tpu.memory_space<vmem>>, %arg4: memref<16x32xf32, #tpu.memory_space<vmem>>) attributes {dimension_semantics = [#tpu.dimension_semantics<parallel>], iteration_bounds = array<i64: 1>, scalar_prefetch = 0 : i64, scratch_operands = 0 : i64, tpu.core_type = #tpu.core_type<tc>, window_params = [{transform_indices = @transform_0, window_bounds = array<i64: 16, 32>}, {pipeline_mode = #tpu.pipeline_mode<synchronous>, transform_indices = @transform_1, window_bounds = array<i64: 1, 32>}, {pipeline_mode = #tpu.pipeline_mode<synchronous>, transform_indices = @transform_2, window_bounds = array<i64: 1, 32>}, {transform_indices = @transform_3, window_bounds = array<i64: 16, 32>}]} {
    %c0 = arith.constant 0 : index
    %c0_0 = arith.constant 0 : index
    %0 = vector.load %arg1[%c0, %c0_0] : memref<16x32xf32, #tpu.memory_space<vmem>>, vector<16x32xf32>
    %cst = arith.constant dense<0.000000e+00> : vector<16xf32>
    %1 = vector.multi_reduction <add>, %0, %cst [1] : vector<16x32xf32> to vector<16xf32>
    %2 = vector.shape_cast %1 : vector<16xf32> to vector<16x1xf32>
    %cst_1 = arith.constant 3.125000e-02 : f32
    %3 = vector.broadcast %cst_1 : f32 to vector<16x1xf32>
    %4 = arith.mulf %2, %3 : vector<16x1xf32>
    %5 = vector.broadcast %4 : vector<16x1xf32> to vector<16x32xf32>
    %6 = arith.subf %0, %5 : vector<16x32xf32>
    %7 = arith.mulf %6, %6 : vector<16x32xf32>
    %cst_2 = arith.constant dense<0.000000e+00> : vector<16xf32>
    %8 = vector.multi_reduction <add>, %7, %cst_2 [1] : vector<16x32xf32> to vector<16xf32>
    %9 = vector.shape_cast %8 : vector<16xf32> to vector<16x1xf32>
    %cst_3 = arith.constant 3.125000e-02 : f32
    %10 = vector.broadcast %cst_3 : f32 to vector<16x1xf32>
    %11 = arith.mulf %9, %10 : vector<16x1xf32>
    %cst_4 = arith.constant 9.99999974E-6 : f32
    %12 = vector.broadcast %cst_4 : f32 to vector<16x1xf32>
    %13 = arith.addf %11, %12 : vector<16x1xf32>
    %14 = math.rsqrt %13 : vector<16x1xf32>
    %c0_5 = arith.constant 0 : index
    %c0_6 = arith.constant 0 : index
    %15 = vector.load %arg2[%c0_5, %c0_6] : memref<1x32xf32, #tpu.memory_space<vmem>>, vector<1x32xf32>
    %c0_7 = arith.constant 0 : index
    %c0_8 = arith.constant 0 : index
    %16 = vector.load %arg3[%c0_7, %c0_8] : memref<1x32xf32, #tpu.memory_space<vmem>>, vector<1x32xf32>
    %17 = vector.broadcast %14 : vector<16x1xf32> to vector<16x32xf32>
    %18 = arith.mulf %6, %17 : vector<16x32xf32>
    %19 = vector.broadcast %15 : vector<1x32xf32> to vector<16x32xf32>
    %20 = arith.mulf %18, %19 : vector<16x32xf32>
    %21 = vector.broadcast %16 : vector<1x32xf32> to vector<16x32xf32>
    %22 = arith.addf %20, %21 : vector<16x32xf32>
    %c0_9 = arith.constant 0 : index
    %c0_10 = arith.constant 0 : index
    %23 = vector.load %arg4[%c0_9, %c0_10] : memref<16x32xf32, #tpu.memory_space<vmem>>, vector<16x32xf32>
    tpu.vector_store %arg4[%c0_9, %c0_10], %22 {strides = array<i32>} : memref<16x32xf32, #tpu.memory_space<vmem>>, vector<16x32xf32>,
    return
  }
  func.func @transform_0(%arg0: i32) -> (i32, i32) {
    %c0_i32 = arith.constant 0 : i32
    %c0_i32_0 = arith.constant 0 : i32
    return %arg0, %c0_i32 : i32, i32
  }
  func.func @transform_1(%arg0: i32) -> (i32, i32) {
    %c0_i32 = arith.constant 0 : i32
    %c0_i32_0 = arith.constant 0 : i32
    %c0_i32_1 = arith.constant 0 : i32
    return %c0_i32, %c0_i32_0 : i32, i32
  }
  func.func @transform_2(%arg0: i32) -> (i32, i32) {
    %c0_i32 = arith.constant 0 : i32
    %c0_i32_0 = arith.constant 0 : i32
    %c0_i32_1 = arith.constant 0 : i32
    return %c0_i32, %c0_i32_0 : i32, i32
  }
  func.func @transform_3(%arg0: i32) -> (i32, i32) {
    %c0_i32 = arith.constant 0 : i32
    %c0_i32_0 = arith.constant 0 : i32
    return %arg0, %c0_i32 : i32, i32
  }
}

</mosaic_0001>

<bundles_post_ra>
// kernel: tpu_custom_call.1
= control target key start
LH: loop header
LB: loop body
LE: loop exit
PB: predicated region body
PF: predicated region fallthrough
CT: control target
= control target key end

     0   :  { %8 = vsyncpa [#allocation3], 0  ;;  %s219_s0 = inlined_call_operand.hbm [shape: f32[16,32], index: 0, kind: input, shape index: {}]   ;;  %s220_s1 = inlined_call_operand.vmem [shape: f32[1,32], index: 1, kind: input, shape index: {}]   ;;  %s221_s2 = inlined_call_operand.vmem [shape: f32[1,32], index: 2, kind: input, shape index: {}]   ;;  %s222_s3 = inlined_call_operand.hbm [shape: f32[16,32], index: 3, kind: output, shape index: {}]  }
   0x1   :  { %9 = vsyncpa [#allocation4], 0  ;;  %s153_s12 = smov [#allocation2]   ;;  %s105_s16 = scalar_lea.hbm %s219_s0, 256 }
   0x2   :  { %s15_s13 = sshll.u32 %s153_s12, 4  ;;  %p106_p0 = scmp.ne.s32.totalorder %s219_s0, %s105_s16  ;;  %s16_s13 = int_to_ptr.vmem [resolvable:$true] %s15_s13 }
   0x3   :  { %p109_p1 = scmp.lt.u32.totalorder %s105_s16, %s219_s0 }
   0x5   :  { %p111_p2 = pnand %p109_p1, %p106_p0 }
   0x7   :  { %114 = shalt.err (!%p111_p2)
}
   0x8   :  { %s115_s21 = scalar_lea.vmem %s16_s13, 256  ;;  %p120_p4 = scmp.lt.s32.totalorder %s16_s13, %s16_s13 }
   0x9   :  { %p116_p3 = scmp.ne.s32.totalorder %s16_s13, %s115_s21  ;;  %p121_p5 = scmp.lt.s32.totalorder %s115_s21, %s115_s21 }
   0xb   :  { %p122_p6 = por %p121_p5, %p120_p4 }
   0xd   :  { %p123_p7 = pnand %p122_p6, %p116_p3 }
   0xf   :  { %126 = shalt.err (!%p123_p7)
}
  0x10   :  { %s154_s22 = smov 128   ;;  %s155_s23 = smov 8  }
  0x11   :  { %21 = dma.hbm_to_vmem [thread:$0]  %s219_s0, 256, %s16_s13, [#allocation3], %s154_s22, %s154_s22, %s155_s23  }
  0x12   :  { %149 = dma.done.wait [#allocation3], 256  }
  0x13   :  { %150 = vsyncadd [#allocation3], 4294967040  ;;  %vm31_vm0 = vcmask 261120   ;;  %v29_v0 = vld [vmem:[#allocation2] sm:$0xff]  ;;  %v30_v1 = vld [vmem:[#allocation2 + $0x8] sm:$0xff]  ;;  %s156_s29 = smov [#allocation5]  }
  0x14   :  { %v32_v2 = vsel %vm31_vm0, %v29_v0, 0.0  ;;  %v35_v3 = vsel %vm31_vm0, %v30_v1, 0.0  ;;  %v95_v21 = vld [vmem:[%s220_s1] ss:$0 sm:$0xff]  ;;  %s83_s30 = sshll.u32 %s156_s29, 4  ;;  %s84_s30 = int_to_ptr.vmem [resolvable:$true] %s83_s30 }
  0x15   :  { %33 = vadd.xlane.f32.xlu0 %v32_v2  ;;  %v96_v23 = vld [vmem:[%s221_s2] ss:$0 sm:$0xff]  ;;  %s127_s4 = scalar_lea.vmem %s84_s30, 256  ;;  %p132_p9 = scmp.lt.s32.totalorder %s84_s30, %s84_s30 }
  0x16   :  { %p128_p8 = scmp.ne.s32.totalorder %s84_s30, %s127_s4  ;;  %p133_p10 = scmp.lt.s32.totalorder %s127_s4, %s127_s4 }
  0x18   :  { %p134_p11 = por %p133_p10, %p132_p9 }
  0x19   :  { %36 = vadd.xlane.f32.xlu0 %v35_v3 }
  0x1a   :  { %p135_p12 = pnand %p134_p11, %p128_p8 }
  0xa2   :  { %v34_v4 = vpop.xlane.xlu0 %33 }
  0xa3   :  { %v38_v5 = vmul.f32 0.03125, %v34_v4 }
  0xa5   :  { %v40_v6 = vsub.f32 %v29_v0, %v38_v5 }
  0xa6   :  { %v37_v7 = vpop.xlane.xlu0 %36 }
  0xa7   :  { %v39_v8 = vmul.f32 0.03125, %v37_v7  ;;  %v42_v9 = vmul.f32 %v40_v6, %v40_v6 }
  0xa9   :  { %v41_v10 = vsub.f32 %v30_v1, %v39_v8  ;;  %v44_v11 = vsel %vm31_vm0, %v42_v9, 0.0 }
  0xaa   :  { %45 = vadd.xlane.f32.xlu1 %v44_v11 }
  0xab   :  { %v43_v12 = vmul.f32 %v41_v10, %v41_v10 }
  0xad   :  { %v47_v13 = vsel %vm31_vm0, %v43_v12, 0.0 }
  0xae   :  { %48 = vadd.xlane.f32.xlu1 %v47_v13 }
 0x137   :  { %v46_v14 = vpop.xlane.xlu1 %45 }
 0x138   :  { %v50_v15 = vmul.f32 0.03125, %v46_v14 }
 0x13a   :  { %v52_v16 = vadd.f32 1e-05, %v50_v15 }
 0x13b   :  { %v49_v17 = vpop.xlane.xlu1 %48 }
 0x13c   :  { %101 = vrsqrt.f32 %v52_v16  ;;  %v51_v18 = vmul.f32 0.03125, %v49_v17 }
 0x13e   :  { %v53_v19 = vadd.f32 1e-05, %v51_v18 }
 0x140   :  { %103 = vrsqrt.f32 %v53_v19 }
 0x146   :  { %v102_v20 = vpop.eup %101 }
 0x147   :  { %v58_v22 = vmul.f32 %v102_v20, %v40_v6 }
 0x149   :  { %v66_v24 = vmul.f32 %v95_v21, %v58_v22 }
 0x14a   :  { %v104_v25 = vpop.eup %103 }
 0x14b   :  { %v59_v26 = vmul.f32 %v104_v25, %v41_v10  ;;  %v74_v27 = vadd.f32 %v96_v23, %v66_v24 }
 0x14d   :  { %v67_v28 = vmul.f32 %v95_v21, %v59_v26  ;;  %76 = vst.msk [vmem:[#allocation5] sm:$0xff] %vm31_vm0, %v74_v27 }
 0x14f   :  { %v75_v29 = vadd.f32 %v96_v23, %v67_v28 }
 0x151   :  { %77 = vst.msk [vmem:[#allocation5 + $0x8] sm:$0xff] %vm31_vm0, %v75_v29 }
 0x152   :  { %138 = shalt.err (!%p135_p12)
}
 0x153   :  { %s139_s5 = scalar_lea.hbm %s222_s3, 256 }
 0x154   :  { %p140_p13 = scmp.ne.s32.totalorder %s222_s3, %s139_s5  ;;  %p143_p0 = scmp.lt.u32.totalorder %s139_s5, %s222_s3 }
 0x156   :  { %p145_p1 = pnand %p143_p0, %p140_p13 }
 0x158   :  { %148 = shalt.err (!%p145_p1)
}
 0x159   :  { %89 = dma.vmem_to_hbm [thread:$0]  %s84_s30, 256, %s222_s3, [#allocation4], %s154_s22, %s154_s22, %s155_s23  }
 0x15a   :  { %151 = dma.done.wait [#allocation4], 256  }
 0x15b   :  { %152 = vsyncadd [#allocation4], 4294967040 }
 0x15c   :  { %93 = vsyncpa [#allocation3], 1 }
 0x15d   :  { %94 = vsyncpa [#allocation4], 1 }

</bundles_post_ra>
